<compile_context>
chip_gen: v7x
topology: tpu7x:2x2x1
jax: 0.10.0
libtpu: 0.0.40
codegen_flags: <defaults>
</compile_context>

<pallas_src>
import functools

import jax
import jax.numpy as jnp
from jax import lax
from jax.experimental import pallas as pl
from jax.experimental.pallas import tpu as pltpu

_LOC = 0.0
_SCALE = 2.0
_LANES = 128
_MAX_BLOCK_ROWS = 1024  # 1024 x 128 x 4 B = 512 KiB per f32 block
                        # (x + bits + out, double-buffered ~= 3 MiB VMEM,
                        #  well under v5e's 16 MiB default scoped limit)


def _laplace_add_kernel(x_ref, bits_ref, o_ref, *, loc, scale):
    """out = x + Laplace(loc, scale), noise from uniform bits via inverse CDF."""
    bits = bits_ref[...]  # uint32 random words

    # Mantissa-bitcast trick: top 23 random bits OR'd into the exponent
    # pattern of 1.0f -> value in [1, 2); subtract 1.0 -> uniform in [0, 1).
    mant = jnp.bitwise_or(jnp.right_shift(bits, jnp.uint32(9)),
                          jnp.uint32(0x3F800000))
    u = lax.bitcast_convert_type(mant, jnp.float32) - jnp.float32(1.0)

    # Inverse-CDF Laplace: v ~ U(-0.5, 0.5),
    # noise = loc - scale * sign(v) * log(1 - 2|v|)
    v = u - jnp.float32(0.5)
    sgn = jnp.where(v >= jnp.float32(0.0), jnp.float32(1.0), jnp.float32(-1.0))
    mag = jnp.maximum(jnp.float32(1.0) - jnp.float32(2.0) * jnp.abs(v),
                      jnp.float32(1e-12))  # guard log(0) at u == 0
    noise = jnp.float32(loc) - jnp.float32(scale) * sgn * jnp.log(mag)

    xf = x_ref[...].astype(jnp.float32)
    o_ref[...] = (xf + noise).astype(o_ref.dtype)


def laplace_mechanism(x, seed=0, loc=_LOC, scale=_SCALE):
    """x + Laplace(loc, scale) noise, elementwise, via a Pallas TPU kernel."""
    orig_shape = x.shape
    orig_dtype = x.dtype
    n = x.size
    flat = x.reshape(-1)  # free metadata op for contiguous NCHW

    # Lane-dense 2D layout: (rows, 128); pick a large row-tile to amortize
    # per-grid-step overhead, rounded to the sublane multiple of 8.
    total_rows = pl.cdiv(n, _LANES)
    if total_rows >= _MAX_BLOCK_ROWS:
        block_rows = _MAX_BLOCK_ROWS
    else:
        block_rows = max(8, ((total_rows + 7) // 8) * 8)
    num_blocks = pl.cdiv(total_rows, block_rows)
    pad_rows = num_blocks * block_rows
    n_pad = pad_rows * _LANES

    if n_pad != n:
        flat = jnp.pad(flat, (0, n_pad - n))
    x2d = flat.reshape(pad_rows, _LANES)

    # Fresh, independent random words per element (threefry; no stream overlap
    # between adjacent seeds).
    key = jax.random.PRNGKey(seed)
    bits2d = jax.random.bits(key, (pad_rows, _LANES), dtype=jnp.uint32)

    kernel = functools.partial(_laplace_add_kernel, loc=loc, scale=scale)

    out2d = pl.pallas_call(
        kernel,
        out_shape=jax.ShapeDtypeStruct((pad_rows, _LANES), orig_dtype),
        grid=(num_blocks,),
        in_specs=[
            pl.BlockSpec((block_rows, _LANES), lambda i: (i, 0)),  # x tile
            pl.BlockSpec((block_rows, _LANES), lambda i: (i, 0)),  # bits tile
        ],
        out_specs=pl.BlockSpec((block_rows, _LANES), lambda i: (i, 0)),
        input_output_aliases={0: 0},  # reuse x's buffer for the output
        compiler_params=pltpu.CompilerParams(
            dimension_semantics=("parallel",)),  # grid steps are independent
    )(x2d, bits2d)

    out_flat = out2d.reshape(-1)
    if n_pad != n:
        out_flat = out_flat[:n]
    return out_flat.reshape(orig_shape)


if __name__ == "__main__":
    key = jax.random.PRNGKey(0)
    x = jax.random.normal(key, (2, 4, 16, 16), dtype=jnp.float32)  # NCHW

    out = laplace_mechanism(x, seed=1234)
    out = jax.block_until_ready(out)

    assert out.shape == x.shape and out.dtype == x.dtype
    noise = out - x
    # Sanity: finite, nonzero noise with mean/std consistent with
    # Laplace(0, 2) (std = scale*sqrt(2) ~= 2.83) at this sample size.
    assert bool(jnp.all(jnp.isfinite(out)))
    assert 1.5 < float(jnp.std(noise)) < 4.5
    assert abs(float(jnp.mean(noise))) < 0.5

    print("KERNEL_OK")
</pallas_src>

<mosaic_0001>
module attributes {stable_mosaic.version = 11 : i64} {
  func.func @_laplace_add_kernel(%arg0: i32, %arg1: memref<16x128xf32, #tpu.memory_space<vmem>>, %arg2: memref<16x128xi32, #tpu.memory_space<vmem>>, %arg3: memref<16x128xf32, #tpu.memory_space<vmem>>) attributes {dimension_semantics = [#tpu.dimension_semantics<parallel>], iteration_bounds = array<i64: 1>, scalar_prefetch = 0 : i64, scratch_operands = 0 : i64, tpu.core_type = #tpu.core_type<tc>, window_params = [{transform_indices = @transform_0, window_bounds = array<i64: 16, 128>}, {transform_indices = @transform_1, window_bounds = array<i64: 16, 128>}, {transform_indices = @transform_2, window_bounds = array<i64: 16, 128>}]} {
    %c0 = arith.constant 0 : index
    %c0_0 = arith.constant 0 : index
    %0 = vector.load %arg2[%c0, %c0_0] : memref<16x128xi32, #tpu.memory_space<vmem>>, vector<16x128xi32>
    %c9_i32 = arith.constant 9 : i32
    %1 = vector.broadcast %c9_i32 : i32 to vector<16x128xi32>
    %2 = arith.shrui %0, %1 : vector<16x128xi32>
    %c1065353216_i32 = arith.constant 1065353216 : i32
    %3 = vector.broadcast %c1065353216_i32 : i32 to vector<16x128xi32>
    %4 = arith.ori %2, %3 : vector<16x128xi32>
    %5 = tpu.bitcast %4 : vector<16x128xi32> -> vector<16x128xf32>
    %cst = arith.constant 1.000000e+00 : f32
    %6 = vector.broadcast %cst : f32 to vector<16x128xf32>
    %7 = arith.subf %5, %6 : vector<16x128xf32>
    %cst_1 = arith.constant 5.000000e-01 : f32
    %8 = vector.broadcast %cst_1 : f32 to vector<16x128xf32>
    %9 = arith.subf %7, %8 : vector<16x128xf32>
    %cst_2 = arith.constant 0.000000e+00 : f32
    %10 = vector.broadcast %cst_2 : f32 to vector<16x128xf32>
    %11 = arith.cmpf oge, %9, %10 : vector<16x128xf32>
    %cst_3 = arith.constant 1.000000e+00 : f32
    %cst_4 = arith.constant -1.000000e+00 : f32
    %12 = vector.broadcast %cst_3 : f32 to vector<16x128xf32>
    %13 = vector.broadcast %cst_4 : f32 to vector<16x128xf32>
    %14 = arith.select %11, %12, %13 : vector<16x128xi1>, vector<16x128xf32>
    %15 = math.absf %9 : vector<16x128xf32>
    %cst_5 = arith.constant 2.000000e+00 : f32
    %16 = vector.broadcast %cst_5 : f32 to vector<16x128xf32>
    %17 = arith.mulf %16, %15 : vector<16x128xf32>
    %cst_6 = arith.constant 1.000000e+00 : f32
    %18 = vector.broadcast %cst_6 : f32 to vector<16x128xf32>
    %19 = arith.subf %18, %17 : vector<16x128xf32>
    %cst_7 = arith.constant 9.99999996E-13 : f32
    %20 = vector.broadcast %cst_7 : f32 to vector<16x128xf32>
    %21 = arith.maximumf %19, %20 : vector<16x128xf32>
    %cst_8 = arith.constant 2.000000e+00 : f32
    %22 = vector.broadcast %cst_8 : f32 to vector<16x128xf32>
    %23 = arith.mulf %22, %14 : vector<16x128xf32>
    %24 = math.log %21 : vector<16x128xf32>
    %25 = arith.mulf %23, %24 : vector<16x128xf32>
    %cst_9 = arith.constant 0.000000e+00 : f32
    %26 = vector.broadcast %cst_9 : f32 to vector<16x128xf32>
    %27 = arith.subf %26, %25 : vector<16x128xf32>
    %c0_10 = arith.constant 0 : index
    %c0_11 = arith.constant 0 : index
    %28 = vector.load %arg1[%c0_10, %c0_11] : memref<16x128xf32, #tpu.memory_space<vmem>>, vector<16x128xf32>
    %29 = arith.addf %28, %27 : vector<16x128xf32>
    %c0_12 = arith.constant 0 : index
    %c0_13 = arith.constant 0 : index
    %30 = vector.load %arg3[%c0_12, %c0_13] : memref<16x128xf32, #tpu.memory_space<vmem>>, vector<16x128xf32>
    tpu.vector_store %arg3[%c0_12, %c0_13], %29 {strides = array<i32>} : memref<16x128xf32, #tpu.memory_space<vmem>>, vector<16x128xf32>,
    return
  }
  func.func @transform_0(%arg0: i32) -> (i32, i32) {
    %c0_i32 = arith.constant 0 : i32
    %c0_i32_0 = arith.constant 0 : i32
    return %arg0, %c0_i32 : i32, i32
  }
  func.func @transform_1(%arg0: i32) -> (i32, i32) {
    %c0_i32 = arith.constant 0 : i32
    %c0_i32_0 = arith.constant 0 : i32
    return %arg0, %c0_i32 : i32, i32
  }
  func.func @transform_2(%arg0: i32) -> (i32, i32) {
    %c0_i32 = arith.constant 0 : i32
    %c0_i32_0 = arith.constant 0 : i32
    return %arg0, %c0_i32 : i32, i32
  }
}

</mosaic_0001>

<bundles_post_ra>
// kernel: tpu_custom_call.1
= control target key start
LH: loop header
LB: loop body
LE: loop exit
PB: predicated region body
PF: predicated region fallthrough
CT: control target
= control target key end

     0   :  { %7 = vsyncpa [#allocation3], 0  ;;  %s200_s0 = inlined_call_operand.hbm [shape: f32[16,128], index: 0, kind: input, shape index: {}, may-alias: {0,2}]   ;;  %s201_s1 = inlined_call_operand.vmem [shape: u32[16,128], index: 1, kind: input, shape index: {}]   ;;  %s202_s2 = inlined_call_operand.hbm [shape: f32[16,128], index: 2, kind: output, shape index: {}, may-alias: {0,2}]  }
   0x1   :  { %8 = vsyncpa [#allocation4], 0  ;;  %s144_s9 = smov [#allocation2]   ;;  %s96_s13 = scalar_lea.hbm %s200_s0, 256 }
   0x2   :  { %s14_s10 = sshll.u32 %s144_s9, 4  ;;  %p97_p0 = scmp.ne.s32.totalorder %s200_s0, %s96_s13  ;;  %s15_s10 = int_to_ptr.vmem [resolvable:$true] %s14_s10 }
   0x3   :  { %p100_p1 = scmp.lt.u32.totalorder %s96_s13, %s200_s0 }
   0x5   :  { %p102_p2 = pnand %p100_p1, %p97_p0 }
   0x7   :  { %105 = shalt.err (!%p102_p2)
}
   0x8   :  { %s106_s18 = scalar_lea.vmem %s15_s10, 256  ;;  %p111_p4 = scmp.lt.s32.totalorder %s15_s10, %s15_s10 }
   0x9   :  { %p107_p3 = scmp.ne.s32.totalorder %s15_s10, %s106_s18  ;;  %p112_p5 = scmp.lt.s32.totalorder %s106_s18, %s106_s18 }
   0xb   :  { %p113_p6 = por %p112_p5, %p111_p4 }
   0xd   :  { %p114_p7 = pnand %p113_p6, %p107_p3 }
   0xf   :  { %117 = shalt.err (!%p114_p7)
}
  0x10   :  { %s145_s19 = smov 128   ;;  %s146_s20 = smov 8  }
  0x11   :  { %20 = dma.hbm_to_vmem [thread:$0]  %s200_s0, 256, %s15_s10, [#allocation3], %s145_s19, %s145_s19, %s146_s20  }
  0x12   :  { %140 = dma.done.wait [#allocation3], 256  }
  0x13   :  { %141 = vsyncadd [#allocation3], 4294967040  ;;  %v26_v0 = vld [vmem:[%s201_s1] sm:$0xff]  ;;  %v27_v1 = vld [vmem:[%s201_s1 + $0x8] sm:$0xff]  ;;  %v147_v18 = vmov -1.0   ;;  %s148_s0 = smov [#allocation5]  }
  0x14   :  { %v28_v2 = vshrl.u32 %v26_v0, 9  ;;  %v29_v3 = vshrl.u32 %v27_v1, 9  ;;  %v60_v28 = vld [vmem:[#allocation2] sm:$0xff]  ;;  %v61_v31 = vld [vmem:[#allocation2 + $0x8] sm:$0xff]  ;;  %s71_s1 = sshll.u32 %s148_s0, 4  ;;  %s72_s1 = int_to_ptr.vmem [resolvable:$true] %s71_s1 }
  0x15   :  { %s118_s27 = scalar_lea.vmem %s72_s1, 256  ;;  %p123_p9 = scmp.lt.s32.totalorder %s72_s1, %s72_s1 }
  0x16   :  { %v30_v4 = vor.u32 1065353216, %v28_v2  ;;  %v31_v5 = vor.u32 1065353216, %v29_v3  ;;  %p119_p8 = scmp.ne.s32.totalorder %s72_s1, %s118_s27  ;;  %p124_p10 = scmp.lt.s32.totalorder %s118_s27, %s118_s27 }
  0x18   :  { %v83_v6 = vadd.f32 -1.0, %v30_v4  ;;  %v84_v7 = vadd.f32 -1.0, %v31_v5  ;;  %p125_p11 = por %p124_p10, %p123_p9 }
  0x1a   :  { %v85_v8 = vadd.f32 -0.5, %v83_v6  ;;  %v86_v9 = vadd.f32 -0.5, %v84_v7  ;;  %p126_p12 = pnand %p125_p11, %p119_p8 }
  0x1c   :  { %v42_v10 = vand.u32 2147483647, %v85_v8  ;;  %v43_v11 = vand.u32 2147483647, %v86_v9  ;;  %vm38_vm0 = vcmp.ge.f32.partialorder %v85_v8, 0.0  ;;  %vm39_vm1 = vcmp.ge.f32.partialorder %v86_v9, 0.0 }
  0x1d   :  { %v40_v19 = vsel %vm38_vm0, 1.0, %v147_v18  ;;  %v41_v20 = vsel %vm39_vm1, 1.0, %v147_v18 }
  0x1e   :  { %v44_v12 = vmul.f32 2.0, %v42_v10  ;;  %v45_v13 = vmul.f32 2.0, %v43_v11  ;;  %v50_v21 = vmul.f32 2.0, %v40_v19  ;;  %v51_v23 = vmul.f32 2.0, %v41_v20 }
  0x20   :  { %v46_v14 = vsub.f32 1.0, %v44_v12  ;;  %v47_v15 = vsub.f32 1.0, %v45_v13 }
  0x22   :  { %v48_v16 = vmax.f32 %v46_v14, 1e-12  ;;  %v49_v17 = vmax.f32 %v47_v15, 1e-12 }
  0x24   :  { %92 = vlog2.f32 %v48_v16 }
  0x25   :  { %94 = vlog2.f32 %v49_v17 }
  0x2e   :  { %v93_v22 = vpop.eup %92 }
  0x2f   :  { %v95_v24 = vpop.eup %94  ;;  %v53_v25 = vmul.f32 0.6931472, %v93_v22 }
  0x30   :  { %v55_v26 = vmul.f32 0.6931472, %v95_v24 }
  0x31   :  { %v56_v27 = vmul.f32 %v53_v25, %v50_v21 }
  0x32   :  { %v57_v29 = vmul.f32 %v55_v26, %v51_v23 }
  0x33   :  { %v58_v30 = vsub.f32 0.0, %v56_v27 }
  0x34   :  { %v59_v32 = vsub.f32 0.0, %v57_v29 }
  0x35   :  { %v62_v33 = vadd.f32 %v60_v28, %v58_v30 }
  0x36   :  { %v63_v34 = vadd.f32 %v61_v31, %v59_v32 }
  0x37   :  { %64 = vst [vmem:[#allocation5] sm:$0xff] %v62_v33 }
  0x38   :  { %65 = vst [vmem:[#allocation5 + $0x8] sm:$0xff] %v63_v34 }
  0x39   :  { %129 = shalt.err (!%p126_p12)
}
  0x3a   :  { %s130_s30 = scalar_lea.hbm %s202_s2, 256 }
  0x3b   :  { %p131_p13 = scmp.ne.s32.totalorder %s202_s2, %s130_s30  ;;  %p134_p0 = scmp.lt.u32.totalorder %s130_s30, %s202_s2 }
  0x3d   :  { %p136_p1 = pnand %p134_p0, %p131_p13 }
  0x3f   :  { %139 = shalt.err (!%p136_p1)
}
  0x40   :  { %77 = dma.vmem_to_hbm [thread:$0]  %s72_s1, 256, %s202_s2, [#allocation4], %s145_s19, %s145_s19, %s146_s20  }
  0x41   :  { %142 = dma.done.wait [#allocation4], 256  }
  0x42   :  { %143 = vsyncadd [#allocation4], 4294967040 }
  0x43   :  { %81 = vsyncpa [#allocation3], 1 }
  0x44   :  { %82 = vsyncpa [#allocation4], 1 }

</bundles_post_ra>
